<compile_context>
chip_gen: v7x
topology: tpu7x:2x2x1
jax: 0.10.0
libtpu: 0.0.40
codegen_flags: <defaults>
</compile_context>

<pallas_src>
import jax
import jax.numpy as jnp
from jax.experimental import pallas as pl
from jax.experimental.pallas import tpu as pltpu

INPUT_SIZE = 784
HIDDEN_SIZE = 256
OUTPUT_SIZE = 1
PAD_OUT = 128  # lane-dense padded width for the final layer


def discriminator_kernel(x_ref, w1_ref, b1_ref, w2_ref, b2_ref, w3_ref, b3_ref,
                         o_ref):
    x = x_ref[...]                                               # [TB, 784] bf16

    # Layer 1: Linear(784 -> 256) + ReLU   (bf16 matmul, f32 accumulate/elementwise)
    h1 = jnp.dot(x, w1_ref[...], preferred_element_type=jnp.float32)
    h1 = jnp.maximum(h1 + b1_ref[...], 0.0)                      # [TB, 256] f32

    # Layer 2: Linear(256 -> 256) + ReLU
    h2 = jnp.dot(h1.astype(jnp.bfloat16), w2_ref[...],
                 preferred_element_type=jnp.float32)
    h2 = jnp.maximum(h2 + b2_ref[...], 0.0)                      # [TB, 256] f32

    # Layer 3: Linear(256 -> 1), zero-padded to 128 lanes, + sigmoid
    logits = jnp.dot(h2.astype(jnp.bfloat16), w3_ref[...],
                     preferred_element_type=jnp.float32)
    o_ref[...] = jax.nn.sigmoid(logits + b3_ref[...])            # [TB, 128] f32


def _default_tile_b():
    """TB = 128 on v5e (matches 4x128^2 MXU M dim), 256 on v6e/v7x."""
    try:
        kind = jax.devices()[0].device_kind.lower()
    except Exception:
        return 256
    return 128 if "v5" in kind else 256


def prepare_params(params):
    """One-time conversion: bf16 matmul weights, f32 biases, w3/b3 padded to 128 lanes."""
    w1, b1, w2, b2, w3, b3 = params
    w3_p = jnp.zeros((HIDDEN_SIZE, PAD_OUT), jnp.float32).at[:, :OUTPUT_SIZE].set(w3)
    b3_p = jnp.zeros((1, PAD_OUT), jnp.float32).at[:, :OUTPUT_SIZE].set(b3)
    return (w1.astype(jnp.bfloat16), b1.astype(jnp.float32),
            w2.astype(jnp.bfloat16), b2.astype(jnp.float32),
            w3_p.astype(jnp.bfloat16), b3_p.astype(jnp.float32))


def discriminator_forward(x, prepared_params, *, tb=None):
    """x: [B, 784] float32 -> [B, 1] float32 (sigmoid probabilities)."""
    w1, b1, w2, b2, w3_p, b3_p = prepared_params
    B = x.shape[0]

    if tb is None:
        tb = _default_tile_b()
    # Shrink tile for small batches; keep it a multiple of 8 sublanes.
    tb = min(tb, max(8, ((B + 7) // 8) * 8))
    b_pad = ((B + tb - 1) // tb) * tb

    x_bf16 = x.astype(jnp.bfloat16)
    if b_pad != B:
        x_bf16 = jnp.pad(x_bf16, ((0, b_pad - B), (0, 0)))

    grid = (b_pad // tb,)

    def resident(a):
        # Weight/bias blocks: full array, same block for every grid step.
        return pl.BlockSpec(a.shape, lambda i: (0, 0))

    out = pl.pallas_call(
        discriminator_kernel,
        out_shape=jax.ShapeDtypeStruct((b_pad, PAD_OUT), jnp.float32),
        grid=grid,
        in_specs=[
            pl.BlockSpec((tb, INPUT_SIZE), lambda i: (i, 0)),   # x tile
            resident(w1), resident(b1),
            resident(w2), resident(b2),
            resident(w3_p), resident(b3_p),
        ],
        out_specs=pl.BlockSpec((tb, PAD_OUT), lambda i: (i, 0)),
        compiler_params=pltpu.CompilerParams(
            dimension_semantics=("parallel",),   # batch-parallel (2 TCs on v7x)
            vmem_limit_bytes=8 << 20,            # ~3 MB live; sized, not 64 MiB
        ),
    )(x_bf16, w1, b1, w2, b2, w3_p, b3_p)

    return out[:B, :OUTPUT_SIZE]


def init_params(key):
    """Deterministic init matching nn.Linear's U(-1/sqrt(fan_in), 1/sqrt(fan_in)).

    Weights stored as [in_features, out_features] (transpose of nn.Linear)."""
    def linear(key, fan_in, fan_out):
        kw, kb = jax.random.split(key)
        bound = 1.0 / jnp.sqrt(fan_in)
        w = jax.random.uniform(kw, (fan_in, fan_out), jnp.float32, -bound, bound)
        b = jax.random.uniform(kb, (1, fan_out), jnp.float32, -bound, bound)
        return w, b

    k1, k2, k3 = jax.random.split(key, 3)
    w1, b1 = linear(k1, INPUT_SIZE, HIDDEN_SIZE)
    w2, b2 = linear(k2, HIDDEN_SIZE, HIDDEN_SIZE)
    w3, b3 = linear(k3, HIDDEN_SIZE, OUTPUT_SIZE)
    return (w1, b1, w2, b2, w3, b3)


def reference_forward(x, prepared_params):
    """Same math as the kernel (bf16 matmul inputs, f32 accumulate/elementwise)."""
    w1, b1, w2, b2, w3_p, b3_p = prepared_params
    xb = x.astype(jnp.bfloat16)
    h1 = jnp.maximum(jnp.dot(xb, w1, preferred_element_type=jnp.float32) + b1, 0.0)
    h2 = jnp.maximum(
        jnp.dot(h1.astype(jnp.bfloat16), w2, preferred_element_type=jnp.float32) + b2,
        0.0)
    out = jax.nn.sigmoid(
        jnp.dot(h2.astype(jnp.bfloat16), w3_p, preferred_element_type=jnp.float32)
        + b3_p)
    return out[:, :OUTPUT_SIZE]


if __name__ == "__main__":
    key = jax.random.PRNGKey(0)
    kx, kp = jax.random.split(key)

    B = 8  # small demo batch (multiple of 8 sublanes)
    x = jax.random.normal(kx, (B, INPUT_SIZE), jnp.float32)
    params = init_params(kp)
    prepared = prepare_params(params)  # one-time: bf16 cast + w3/b3 padding

    out = discriminator_forward(x, prepared)
    out = jax.block_until_ready(out)

    ref = reference_forward(x, prepared)
    assert out.shape == (B, OUTPUT_SIZE), out.shape
    assert jnp.allclose(out, ref, atol=1e-3, rtol=1e-3), (
        f"max err {jnp.max(jnp.abs(out - ref))}")

    print("KERNEL_OK")
</pallas_src>

<mosaic_0001>
module attributes {stable_mosaic.version = 11 : i64} {
  func.func @discriminator_kernel(%arg0: i32, %arg1: memref<8x784xbf16, #tpu.memory_space<vmem>>, %arg2: memref<784x256xbf16, #tpu.memory_space<vmem>>, %arg3: memref<1x256xf32, #tpu.memory_space<vmem>>, %arg4: memref<256x256xbf16, #tpu.memory_space<vmem>>, %arg5: memref<1x256xf32, #tpu.memory_space<vmem>>, %arg6: memref<256x128xbf16, #tpu.memory_space<vmem>>, %arg7: memref<1x128xf32, #tpu.memory_space<vmem>>, %arg8: memref<8x128xf32, #tpu.memory_space<vmem>>) attributes {dimension_semantics = [#tpu.dimension_semantics<parallel>], iteration_bounds = array<i64: 1>, scalar_prefetch = 0 : i64, scratch_operands = 0 : i64, tpu.core_type = #tpu.core_type<tc>, window_params = [{transform_indices = @transform_0, window_bounds = array<i64: 8, 784>}, {pipeline_mode = #tpu.pipeline_mode<synchronous>, transform_indices = @transform_1, window_bounds = array<i64: 784, 256>}, {pipeline_mode = #tpu.pipeline_mode<synchronous>, transform_indices = @transform_2, window_bounds = array<i64: 1, 256>}, {pipeline_mode = #tpu.pipeline_mode<synchronous>, transform_indices = @transform_3, window_bounds = array<i64: 256, 256>}, {pipeline_mode = #tpu.pipeline_mode<synchronous>, transform_indices = @transform_4, window_bounds = array<i64: 1, 256>}, {pipeline_mode = #tpu.pipeline_mode<synchronous>, transform_indices = @transform_5, window_bounds = array<i64: 256, 128>}, {pipeline_mode = #tpu.pipeline_mode<synchronous>, transform_indices = @transform_6, window_bounds = array<i64: 1, 128>}, {transform_indices = @transform_7, window_bounds = array<i64: 8, 128>}]} {
    %c0 = arith.constant 0 : index
    %c0_0 = arith.constant 0 : index
    %0 = vector.load %arg1[%c0, %c0_0] : memref<8x784xbf16, #tpu.memory_space<vmem>>, vector<8x784xbf16>
    %c0_1 = arith.constant 0 : index
    %c0_2 = arith.constant 0 : index
    %1 = vector.load %arg2[%c0_1, %c0_2] : memref<784x256xbf16, #tpu.memory_space<vmem>>, vector<784x256xbf16>
    %cst = arith.constant dense<0.000000e+00> : vector<8x256xf32>
    %2 = tpu.matmul %0, %1, %cst {dimension_numbers = #tpu.dot_dimension_numbers<[1], [0], [0], [1], [0, 0, 1, 1], [], []>} : vector<8x784xbf16>, vector<784x256xbf16>, vector<8x256xf32> -> vector<8x256xf32>
    %c0_3 = arith.constant 0 : index
    %c0_4 = arith.constant 0 : index
    %3 = vector.load %arg3[%c0_3, %c0_4] : memref<1x256xf32, #tpu.memory_space<vmem>>, vector<1x256xf32>
    %4 = vector.broadcast %3 : vector<1x256xf32> to vector<8x256xf32>
    %5 = arith.addf %2, %4 : vector<8x256xf32>
    %cst_5 = arith.constant 0.000000e+00 : f32
    %6 = vector.broadcast %cst_5 : f32 to vector<8x256xf32>
    %7 = arith.maximumf %5, %6 : vector<8x256xf32>
    %8 = arith.truncf %7 : vector<8x256xf32> to vector<8x256xbf16>
    %c0_6 = arith.constant 0 : index
    %c0_7 = arith.constant 0 : index
    %9 = vector.load %arg4[%c0_6, %c0_7] : memref<256x256xbf16, #tpu.memory_space<vmem>>, vector<256x256xbf16>
    %cst_8 = arith.constant dense<0.000000e+00> : vector<8x256xf32>
    %10 = tpu.matmul %8, %9, %cst_8 {dimension_numbers = #tpu.dot_dimension_numbers<[1], [0], [0], [1], [0, 0, 1, 1], [], []>} : vector<8x256xbf16>, vector<256x256xbf16>, vector<8x256xf32> -> vector<8x256xf32>
    %c0_9 = arith.constant 0 : index
    %c0_10 = arith.constant 0 : index
    %11 = vector.load %arg5[%c0_9, %c0_10] : memref<1x256xf32, #tpu.memory_space<vmem>>, vector<1x256xf32>
    %12 = vector.broadcast %11 : vector<1x256xf32> to vector<8x256xf32>
    %13 = arith.addf %10, %12 : vector<8x256xf32>
    %cst_11 = arith.constant 0.000000e+00 : f32
    %14 = vector.broadcast %cst_11 : f32 to vector<8x256xf32>
    %15 = arith.maximumf %13, %14 : vector<8x256xf32>
    %16 = arith.truncf %15 : vector<8x256xf32> to vector<8x256xbf16>
    %c0_12 = arith.constant 0 : index
    %c0_13 = arith.constant 0 : index
    %17 = vector.load %arg6[%c0_12, %c0_13] : memref<256x128xbf16, #tpu.memory_space<vmem>>, vector<256x128xbf16>
    %cst_14 = arith.constant dense<0.000000e+00> : vector<8x128xf32>
    %18 = tpu.matmul %16, %17, %cst_14 {dimension_numbers = #tpu.dot_dimension_numbers<[1], [0], [0], [1], [0, 0, 1, 1], [], []>} : vector<8x256xbf16>, vector<256x128xbf16>, vector<8x128xf32> -> vector<8x128xf32>
    %c0_15 = arith.constant 0 : index
    %c0_16 = arith.constant 0 : index
    %19 = vector.load %arg7[%c0_15, %c0_16] : memref<1x128xf32, #tpu.memory_space<vmem>>, vector<1x128xf32>
    %20 = vector.broadcast %19 : vector<1x128xf32> to vector<8x128xf32>
    %21 = arith.addf %18, %20 : vector<8x128xf32>
    %22 = arith.negf %21 : vector<8x128xf32>
    %23 = math.exp %22 : vector<8x128xf32>
    %cst_17 = arith.constant 1.000000e+00 : f32
    %24 = vector.broadcast %cst_17 : f32 to vector<8x128xf32>
    %25 = arith.addf %24, %23 : vector<8x128xf32>
    %26 = arith.divf %24, %25 : vector<8x128xf32>
    %c0_18 = arith.constant 0 : index
    %c0_19 = arith.constant 0 : index
    %27 = vector.load %arg8[%c0_18, %c0_19] : memref<8x128xf32, #tpu.memory_space<vmem>>, vector<8x128xf32>
    tpu.vector_store %arg8[%c0_18, %c0_19], %26 {strides = array<i32>} : memref<8x128xf32, #tpu.memory_space<vmem>>, vector<8x128xf32>,
    return
  }
  func.func @transform_0(%arg0: i32) -> (i32, i32) {
    %c0_i32 = arith.constant 0 : i32
    %c0_i32_0 = arith.constant 0 : i32
    return %arg0, %c0_i32 : i32, i32
  }
  func.func @transform_1(%arg0: i32) -> (i32, i32) {
    %c0_i32 = arith.constant 0 : i32
    %c0_i32_0 = arith.constant 0 : i32
    %c0_i32_1 = arith.constant 0 : i32
    return %c0_i32, %c0_i32_0 : i32, i32
  }
  func.func @transform_2(%arg0: i32) -> (i32, i32) {
    %c0_i32 = arith.constant 0 : i32
    %c0_i32_0 = arith.constant 0 : i32
    %c0_i32_1 = arith.constant 0 : i32
    return %c0_i32, %c0_i32_0 : i32, i32
  }
  func.func @transform_3(%arg0: i32) -> (i32, i32) {
    %c0_i32 = arith.constant 0 : i32
    %c0_i32_0 = arith.constant 0 : i32
    %c0_i32_1 = arith.constant 0 : i32
    return %c0_i32, %c0_i32_0 : i32, i32
  }
  func.func @transform_4(%arg0: i32) -> (i32, i32) {
    %c0_i32 = arith.constant 0 : i32
    %c0_i32_0 = arith.constant 0 : i32
    %c0_i32_1 = arith.constant 0 : i32
    return %c0_i32, %c0_i32_0 : i32, i32
  }
  func.func @transform_5(%arg0: i32) -> (i32, i32) {
    %c0_i32 = arith.constant 0 : i32
    %c0_i32_0 = arith.constant 0 : i32
    %c0_i32_1 = arith.constant 0 : i32
    return %c0_i32, %c0_i32_0 : i32, i32
  }
  func.func @transform_6(%arg0: i32) -> (i32, i32) {
    %c0_i32 = arith.constant 0 : i32
    %c0_i32_0 = arith.constant 0 : i32
    %c0_i32_1 = arith.constant 0 : i32
    return %c0_i32, %c0_i32_0 : i32, i32
  }
  func.func @transform_7(%arg0: i32) -> (i32, i32) {
    %c0_i32 = arith.constant 0 : i32
    %c0_i32_0 = arith.constant 0 : i32
    return %arg0, %c0_i32 : i32, i32
  }
}

</mosaic_0001>

<bundles_post_ra>
// kernel: tpu_custom_call.1
= control target key start
LH: loop header
LB: loop body
LE: loop exit
PB: predicated region body
PF: predicated region fallthrough
CT: control target
= control target key end

     0   :  { %12 = vsyncpa [#allocation3], 0  ;;  %s2006_s0 = inlined_call_operand.hbm [shape: bf16[8,784], index: 0, kind: input, shape index: {}]   ;;  %s2007_s1 = inlined_call_operand.hbm [shape: bf16[784,256], index: 1, kind: input, shape index: {}]   ;;  %s2008_s2 = inlined_call_operand.vmem [shape: f32[1,256], index: 2, kind: input, shape index: {}]   ;;  %s2009_s3 = inlined_call_operand.hbm [shape: bf16[256,256], index: 3, kind: input, shape index: {}]   ;;  %s2010_s4 = inlined_call_operand.vmem [shape: f32[1,256], index: 4, kind: input, shape index: {}]   ;;  %s2011_s5 = inlined_call_operand.hbm [shape: bf16[256,128], index: 5, kind: input, shape index: {}]   ;;  %s2012_s6 = inlined_call_operand.vmem [shape: f32[1,128], index: 6, kind: input, shape index: {}]   ;;  %s2013_s7 = inlined_call_operand.hbm [shape: f32[8,128], index: 7, kind: output, shape index: {}]  }
   0x1   :  { %13 = vsyncpa [#allocation6], 0 }
   0x2   :  { %14 = vsyncpa [#allocation9], 0 }
   0x3   :  { %15 = vsyncpa [#allocation4], 0  ;;  %s1869_s24 = smov [#allocation5]   ;;  %s1751_s28 = scalar_lea.hbm %s2007_s1, 12544 }
   0x4   :  { %s31_s25 = sshll.u32 %s1869_s24, 4  ;;  %p1752_p0 = scmp.ne.s32.totalorder %s2007_s1, %s1751_s28  ;;  %s32_s25 = int_to_ptr.vmem [resolvable:$true] %s31_s25 }
   0x5   :  { %p1755_p1 = scmp.lt.u32.totalorder %s1751_s28, %s2007_s1 }
   0x7   :  { %p1757_p2 = pnand %p1755_p1, %p1752_p0 }
   0x9   :  { %1760 = shalt.err (!%p1757_p2)
}
   0xa   :  { %s1761_s10 = scalar_lea.vmem %s32_s25, 12544  ;;  %p1766_p4 = scmp.lt.s32.totalorder %s32_s25, %s32_s25 }
   0xb   :  { %p1762_p3 = scmp.ne.s32.totalorder %s32_s25, %s1761_s10  ;;  %p1767_p5 = scmp.lt.s32.totalorder %s1761_s10, %s1761_s10 }
   0xd   :  { %p1768_p6 = por %p1767_p5, %p1766_p4 }
   0xf   :  { %p1769_p7 = pnand %p1768_p6, %p1762_p3 }
  0x11   :  { %1772 = shalt.err (!%p1769_p7)
}
  0x12   :  { %s1870_s11 = smov 128   ;;  %s1871_s12 = smov 8  }
  0x13   :  { %37 = dma.hbm_to_vmem [thread:$0]  %s2007_s1, 12544, %s32_s25, [#allocation6], %s1870_s11, %s1870_s11, %s1871_s12  }
  0x14   :  { %s1872_s15 = smov [#allocation2]   ;;  %s1873_s17 = smov [#allocation7]  }
  0x15   :  { %s22_s16 = sshll.u32 %s1872_s15, 4  ;;  %s45_s18 = sshll.u32 %s1873_s17, 4  ;;  %s23_s16 = int_to_ptr.vmem [resolvable:$true] %s22_s16  ;;  %s46_s18 = int_to_ptr.vmem [resolvable:$true] %s45_s18 }
  0x16   :  { %s1773_s21 = scalar_lea.hbm %s2006_s0, 448 }
  0x17   :  { %p1774_p8 = scmp.ne.s32.totalorder %s2006_s0, %s1773_s21  ;;  %p1777_p9 = scmp.lt.u32.totalorder %s1773_s21, %s2006_s0 }
  0x19   :  { %p1779_p10 = pnand %p1777_p9, %p1774_p8 }
  0x1b   :  { %1782 = shalt.err (!%p1779_p10)
}
  0x1c   :  { %s1783_s1 = scalar_lea.vmem %s23_s16, 448  ;;  %p1788_p12 = scmp.lt.s32.totalorder %s23_s16, %s23_s16 }
  0x1d   :  { %p1784_p11 = scmp.ne.s32.totalorder %s23_s16, %s1783_s1  ;;  %p1789_p13 = scmp.lt.s32.totalorder %s1783_s1, %s1783_s1 }
  0x1f   :  { %p1790_p0 = por %p1789_p13, %p1788_p12 }
  0x21   :  { %p1791_p1 = pnand %p1790_p0, %p1784_p11 }
  0x23   :  { %1794 = shalt.err (!%p1791_p1)
}
  0x24   :  { %25 = dma.hbm_to_vmem [thread:$0]  %s2006_s0, 448, %s23_s16, [#allocation3]  }
  0x25   :  { %s1795_s30 = scalar_lea.hbm %s2009_s3, 4096 }
  0x26   :  { %p1796_p2 = scmp.ne.s32.totalorder %s2009_s3, %s1795_s30  ;;  %p1799_p3 = scmp.lt.u32.totalorder %s1795_s30, %s2009_s3 }
  0x28   :  { %p1801_p4 = pnand %p1799_p3, %p1796_p2 }
  0x2a   :  { %1804 = shalt.err (!%p1801_p4)
}
  0x2b   :  { %s1805_s14 = scalar_lea.vmem %s46_s18, 4096  ;;  %p1810_p6 = scmp.lt.s32.totalorder %s46_s18, %s46_s18 }
  0x2c   :  { %p1806_p5 = scmp.ne.s32.totalorder %s46_s18, %s1805_s14  ;;  %p1811_p7 = scmp.lt.s32.totalorder %s1805_s14, %s1805_s14 }
  0x2e   :  { %p1812_p8 = por %p1811_p7, %p1810_p6 }
  0x30   :  { %p1813_p9 = pnand %p1812_p8, %p1806_p5 }
  0x32   :  { %1816 = shalt.err (!%p1813_p9)
}
  0x33   :  { %51 = dma.hbm_to_vmem [thread:$0]  %s2009_s3, 4096, %s46_s18, [#allocation6], %s1870_s11, %s1870_s11, %s1871_s12  }
  0x34   :  { %s1874_s16 = smov [#allocation8]   ;;  %s1817_s21 = scalar_lea.hbm %s2011_s5, 2048 }
  0x35   :  { %s59_s17 = sshll.u32 %s1874_s16, 4  ;;  %p1818_p10 = scmp.ne.s32.totalorder %s2011_s5, %s1817_s21  ;;  %s60_s17 = int_to_ptr.vmem [resolvable:$true] %s59_s17 }
  0x36   :  { %p1821_p11 = scmp.lt.u32.totalorder %s1817_s21, %s2011_s5 }
  0x38   :  { %p1823_p12 = pnand %p1821_p11, %p1818_p10 }
  0x3a   :  { %1826 = shalt.err (!%p1823_p12)
}
  0x3b   :  { %s1827_s1 = scalar_lea.vmem %s60_s17, 2048  ;;  %p1832_p0 = scmp.lt.s32.totalorder %s60_s17, %s60_s17 }
  0x3c   :  { %p1828_p13 = scmp.ne.s32.totalorder %s60_s17, %s1827_s1  ;;  %p1833_p1 = scmp.lt.s32.totalorder %s1827_s1, %s1827_s1 }
  0x3e   :  { %p1834_p2 = por %p1833_p1, %p1832_p0 }
  0x40   :  { %p1835_p3 = pnand %p1834_p2, %p1828_p13 }
  0x42   :  { %1838 = shalt.err (!%p1835_p3)
}
  0x43   :  { %s1875_s3 = smov 64   ;;  %s1876_s11 = smov 4  }
  0x44   :  { %65 = dma.hbm_to_vmem [thread:$0]  %s2011_s5, 2048, %s60_s17, [#allocation9], %s1875_s3, %s1875_s3, %s1876_s11  }
  0x45   :  { %1861 = dma.done.wait [#allocation3], 448  }
  0x46   :  { %1862 = vsyncadd [#allocation3], 4294966848 }
  0x47   :  { %1863 = dma.done.wait [#allocation6], 16640  }
  0x48   :  { %1864 = vsyncadd [#allocation6], 4294950656 }
  0x49   :  { %1865 = dma.done.wait [#allocation9], 2048  }
  0x4a   :  { %1866 = vsyncadd [#allocation9], 4294965248  ;;  %v1529_v0 = vld [vmem:[#allocation5 + $0x104] ss:$8 sps:$4 sm:$0xff]   ;;  %v1531_v1 = vld [vmem:[#allocation5 + $0x100] ss:$8 sps:$4 sm:$0xff]  }
  0x4b   :  { %754 = vmatprep.subr.bf16.mxu0 %v1529_v0  ;;  %v1532_v2 = vld [vmem:[#allocation5 + $0x114] ss:$8 sps:$4 sm:$0xff]   ;;  %v1534_v3 = vld [vmem:[#allocation5 + $0x110] ss:$8 sps:$4 sm:$0xff]   ;;  %v1535_v4 = vld [vmem:[#allocation5 + $0x124] ss:$8 sps:$4 sm:$0xff]  }
  0x4c   :  { %755 = vmatpush1.bf16.msra.mxu0 %v1531_v1  ;;  %v1537_v5 = vld [vmem:[#allocation5 + $0x120] ss:$8 sps:$4 sm:$0xff]   ;;  %v1538_v6 = vld [vmem:[#allocation5 + $0x134] ss:$8 sps:$4 sm:$0xff]   ;;  %v1540_v7 = vld [vmem:[#allocation5 + $0x130] ss:$8 sps:$4 sm:$0xff]  }
  0x4d   :  { %756 = vmatprep.subr.bf16.mxu0 %v1532_v2  ;;  %v1541_v8 = vld [vmem:[#allocation5 + $0x144] ss:$8 sps:$4 sm:$0xff]   ;;  %v1543_v9 = vld [vmem:[#allocation5 + $0x140] ss:$8 sps:$4 sm:$0xff]   ;;  %v1544_v10 = vld [vmem:[#allocation5 + $0x154] ss:$8 sps:$4 sm:$0xff]  }
  0x4e   :  { %v1546_v11 = vld [vmem:[#allocation5 + $0x150] ss:$8 sps:$4 sm:$0xff]   ;;  %v1547_v12 = vld [vmem:[#allocation5 + $0x164] ss:$8 sps:$4 sm:$0xff]   ;;  %v1549_v15 = vld [vmem:[#allocation5 + $0x160] ss:$8 sps:$4 sm:$0xff]  }
  0x4f   :  { %v1973_v13 = vld [vmem:[#allocation2 + $0x8] sm:$0xff]  ;;  %v1550_v16 = vld [vmem:[#allocation5 + $0x174] ss:$8 sps:$4 sm:$0xff]   ;;  %v1590_v19 = vld [vmem:[#allocation5] ss:$8 sps:$4 sm:$0xff]   ;;  %vm709_vm0 = vcmask 130048  }
  0x50   :  { %757 = vmatpush1.bf16.msra.mxu0 %v1534_v3  ;;  %v1332_v14 = vcombine.high %v1973_v13, %v1973_v13  ;;  %v1585_v17 = vld [vmem:[#allocation5 + $0x4] ss:$8 sps:$4 sm:$0xff]   ;;  %v1552_v18 = vld [vmem:[#allocation5 + $0x170] ss:$8 sps:$4 sm:$0xff]   ;;  %v1591_v20 = vld [vmem:[#allocation5 + $0x14] ss:$8 sps:$4 sm:$0xff]   ;;  %v1331_v57 = vcombine.low %v1973_v13, %v1973_v13 }
  0x51   :  { %758 = vmatprep.subr.bf16.mxu0 %v1535_v4  ;;  %713 = vmatprep.subr.bf16.mxu1 %v1585_v17  ;;  %v1553_v21 = vld [vmem:[#allocation5 + $0x184] ss:$8 sps:$4 sm:$0xff]   ;;  %v1596_v22 = vld [vmem:[#allocation5 + $0x10] ss:$8 sps:$4 sm:$0xff]   ;;  %v1555_v24 = vld [vmem:[#allocation5 + $0x180] ss:$8 sps:$4 sm:$0xff]  }
  0x52   :  { %786 = vmatprep.mubr.bf16.mxu0 %v1332_v14  ;;  %714 = vmatpush1.bf16.msra.mxu1 %v1590_v19  ;;  %v1597_v23 = vld [vmem:[#allocation5 + $0x24] ss:$8 sps:$4 sm:$0xff]   ;;  %v1556_v25 = vld [vmem:[#allocation5 + $0x194] ss:$8 sps:$4 sm:$0xff]   ;;  %v1602_v26 = vld [vmem:[#allocation5 + $0x20] ss:$8 sps:$4 sm:$0xff]  }
  0x53   :  { %715 = vmatprep.subr.bf16.mxu1 %v1591_v20  ;;  %v1603_v27 = vld [vmem:[#allocation5 + $0x34] ss:$8 sps:$4 sm:$0xff]   ;;  %v1558_v28 = vld [vmem:[#allocation5 + $0x190] ss:$8 sps:$4 sm:$0xff]   ;;  %v1559_v29 = vld [vmem:[#allocation5 + $0x1a4] ss:$8 sps:$4 sm:$0xff]  }
  0x54   :  { %759 = vmatpush1.bf16.msra.mxu0 %v1537_v5  ;;  %v1608_v30 = vld [vmem:[#allocation5 + $0x30] ss:$8 sps:$4 sm:$0xff]   ;;  %v1609_v31 = vld [vmem:[#allocation5 + $0x44] ss:$8 sps:$4 sm:$0xff]   ;;  %v1561_v32 = vld [vmem:[#allocation5 + $0x1a0] ss:$8 sps:$4 sm:$0xff]  }
  0x55   :  { %760 = vmatprep.subr.bf16.mxu0 %v1538_v6  ;;  %v1562_v33 = vld [vmem:[#allocation5 + $0x1b4] ss:$8 sps:$4 sm:$0xff]   ;;  %v1614_v34 = vld [vmem:[#allocation5 + $0x40] ss:$8 sps:$4 sm:$0xff]   ;;  %v1564_v36 = vld [vmem:[#allocation5 + $0x1b0] ss:$8 sps:$4 sm:$0xff]  }
  0x56   :  { %716 = vmatpush1.bf16.msra.mxu1 %v1596_v22  ;;  %v1615_v35 = vld [vmem:[#allocation5 + $0x54] ss:$8 sps:$4 sm:$0xff]   ;;  %v1565_v37 = vld [vmem:[#allocation5 + $0x1c4] ss:$8 sps:$4 sm:$0xff]   ;;  %v1620_v38 = vld [vmem:[#allocation5 + $0x50] ss:$8 sps:$4 sm:$0xff]  }
  0x57   :  { %717 = vmatprep.subr.bf16.mxu1 %v1597_v23  ;;  %v1621_v39 = vld [vmem:[#allocation5 + $0x64] ss:$8 sps:$4 sm:$0xff]   ;;  %v1567_v40 = vld [vmem:[#allocation5 + $0x1c0] ss:$8 sps:$4 sm:$0xff]   ;;  %v1568_v41 = vld [vmem:[#allocation5 + $0x1d4] ss:$8 sps:$4 sm:$0xff]  }
  0x58   :  { %761 = vmatpush1.bf16.msra.mxu0 %v1540_v7  ;;  %v1626_v42 = vld [vmem:[#allocation5 + $0x60] ss:$8 sps:$4 sm:$0xff]   ;;  %v1627_v43 = vld [vmem:[#allocation5 + $0x74] ss:$8 sps:$4 sm:$0xff]   ;;  %v1570_v44 = vld [vmem:[#allocation5 + $0x1d0] ss:$8 sps:$4 sm:$0xff]  }
  0x59   :  { %762 = vmatprep.subr.bf16.mxu0 %v1541_v8  ;;  %v1571_v45 = vld [vmem:[#allocation5 + $0x1e4] ss:$8 sps:$4 sm:$0xff]   ;;  %v1632_v46 = vld [vmem:[#allocation5 + $0x70] ss:$8 sps:$4 sm:$0xff]   ;;  %v1573_v48 = vld [vmem:[#allocation5 + $0x1e0] ss:$8 sps:$4 sm:$0xff]  }
  0x5a   :  { %718 = vmatpush1.bf16.msra.mxu1 %v1602_v26  ;;  %v1633_v47 = vld [vmem:[#allocation5 + $0x84] ss:$8 sps:$4 sm:$0xff]   ;;  %v1574_v49 = vld [vmem:[#allocation5 + $0x1f4] ss:$8 sps:$4 sm:$0xff]   ;;  %v1638_v50 = vld [vmem:[#allocation5 + $0x80] ss:$8 sps:$4 sm:$0xff]  }
  0x5b   :  { %719 = vmatprep.subr.bf16.mxu1 %v1603_v27  ;;  %v1639_v51 = vld [vmem:[#allocation5 + $0x94] ss:$8 sps:$4 sm:$0xff]   ;;  %v1576_v52 = vld [vmem:[#allocation5 + $0x1f0] ss:$8 sps:$4 sm:$0xff]   ;;  %v1581_v53 = vld [vmem:[#allocation5 + $0x204] ss:$8 sps:$4 sm:$0xff]  }
  0x5c   :  { %763 = vmatpush1.bf16.msra.mxu0 %v1543_v9  ;;  %v1644_v54 = vld [vmem:[#allocation5 + $0x90] ss:$8 sps:$4 sm:$0xff]   ;;  %v1645_v55 = vld [vmem:[#allocation5 + $0xa4] ss:$8 sps:$4 sm:$0xff]   ;;  %v1579_v58 = vld [vmem:[#allocation5 + $0x200] ss:$8 sps:$4 sm:$0xff]  }
  0x5d   :  { %764 = vmatprep.subr.bf16.mxu0 %v1544_v10  ;;  %v1977_v56 = vld [vmem:[#allocation2 + $0x10] sm:$0xff]  ;;  %v1650_v61 = vld [vmem:[#allocation5 + $0xa0] ss:$8 sps:$4 sm:$0xff]   ;;  %v1589_v1 = vld [vmem:[#allocation5 + $0x224] ss:$8 sps:$4 sm:$0xff]  }
  0x5e   :  { %720 = vmatpush1.bf16.msra.mxu1 %v1608_v30  ;;  %v1334_v59 = vcombine.high %v1977_v56, %v1977_v56  ;;  %v1584_v60 = vld [vmem:[#allocation5 + $0x214] ss:$8 sps:$4 sm:$0xff]   ;;  %v1582_v63 = vld [vmem:[#allocation5 + $0x210] ss:$8 sps:$4 sm:$0xff]   ;;  %v81_v0 = vld [vmem:[#allocation2] sm:$0xff] }
  0x5f   :  { %721 = vmatprep.subr.bf16.mxu1 %v1609_v31  ;;  %v1651_v62 = vld [vmem:[#allocation5 + $0xb4] ss:$8 sps:$4 sm:$0xff]   ;;  %v1330_v2 = vcombine.high %v81_v0, %v81_v0  ;;  %v1656_v3 = vld [vmem:[#allocation5 + $0xb0] ss:$8 sps:$4 sm:$0xff]   ;;  %v1657_v4 = vld [vmem:[#allocation5 + $0xc4] ss:$8 sps:$4 sm:$0xff]  }
  0x60   :  { %765 = vmatpush1.bf16.msra.mxu0 %v1546_v11  ;;  %v1587_v5 = vld [vmem:[#allocation5 + $0x220] ss:$8 sps:$4 sm:$0xff]   ;;  %v1595_v6 = vld [vmem:[#allocation5 + $0x234] ss:$8 sps:$4 sm:$0xff]   ;;  %v1593_v9 = vld [vmem:[#allocation5 + $0x230] ss:$8 sps:$4 sm:$0xff]  }
  0x61   :  { %766 = vmatprep.subr.bf16.mxu0 %v1547_v12  ;;  %745 = vmatprep.mubr.bf16.mxu1 %v1330_v2  ;;  %v1662_v7 = vld [vmem:[#allocation5 + $0xc0] ss:$8 sps:$4 sm:$0xff]   ;;  %v1663_v8 = vld [vmem:[#allocation5 + $0xd4] ss:$8 sps:$4 sm:$0xff]   ;;  %v1601_v10 = vld [vmem:[#allocation5 + $0x244] ss:$8 sps:$4 sm:$0xff]  }
  0x62   :  { %722 = vmatpush1.bf16.msra.mxu1 %v1614_v34  ;;  %v1668_v11 = vld [vmem:[#allocation5 + $0xd0] ss:$8 sps:$4 sm:$0xff]   ;;  %v1671_v12 = vld [vmem:[#allocation5 + $0xe4] ss:$8 sps:$4 sm:$0xff]   ;;  %v1599_v13 = vld [vmem:[#allocation5 + $0x240] ss:$8 sps:$4 sm:$0xff]  }
  0x63   :  { %723 = vmatprep.subr.bf16.mxu1 %v1615_v35  ;;  %v1607_v14 = vld [vmem:[#allocation5 + $0x254] ss:$8 sps:$4 sm:$0xff]   ;;  %v1605_v17 = vld [vmem:[#allocation5 + $0x250] ss:$8 sps:$4 sm:$0xff]   ;;  %v1625_v27 = vld [vmem:[#allocation5 + $0x284] ss:$8 sps:$4 sm:$0xff]  }
  0x64   :  { %767 = vmatpush1.bf16.msra.mxu0 %v1549_v15  ;;  %v1676_v15 = vld [vmem:[#allocation5 + $0xe0] ss:$8 sps:$4 sm:$0xff]   ;;  %v1679_v19 = vld [vmem:[#allocation5 + $0xf0] ss:$8 sps:$4 sm:$0xff]   ;;  %v1685_v20 = vld [vmem:[#allocation7 + $0x4] ss:$8 sps:$4 sm:$0xff]  }
  0x65   :  { %768 = vmatprep.subr.bf16.mxu0 %v1550_v16  ;;  %v1677_v16 = vld [vmem:[#allocation5 + $0xf4] ss:$8 sps:$4 sm:$0xff]   ;;  %v1683_v23 = vld [vmem:[#allocation7] ss:$8 sps:$4 sm:$0xff]   ;;  %v1623_v30 = vld [vmem:[#allocation5 + $0x280] ss:$8 sps:$4 sm:$0xff]  }
  0x66   :  { %724 = vmatpush1.bf16.msra.mxu1 %v1620_v38  ;;  %v1619_v22 = vld [vmem:[#allocation5 + $0x274] ss:$8 sps:$4 sm:$0xff]   ;;  %v1617_v26 = vld [vmem:[#allocation5 + $0x270] ss:$8 sps:$4 sm:$0xff]   ;;  %v1637_v35 = vld [vmem:[#allocation5 + $0x2a4] ss:$8 sps:$4 sm:$0xff]  }
  0x67   :  { %725 = vmatprep.subr.bf16.mxu1 %v1621_v39  ;;  %v1631_v31 = vld [vmem:[#allocation5 + $0x294] ss:$8 sps:$4 sm:$0xff]   ;;  %v1629_v34 = vld [vmem:[#allocation5 + $0x290] ss:$8 sps:$4 sm:$0xff]   ;;  %v1635_v38 = vld [vmem:[#allocation5 + $0x2a0] ss:$8 sps:$4 sm:$0xff]  }
  0x68   :  { %769 = vmatpush1.bf16.msra.mxu0 %v1552_v18  ;;  %v1613_v18 = vld [vmem:[#allocation5 + $0x264] ss:$8 sps:$4 sm:$0xff]   ;;  %v1643_v39 = vld [vmem:[#allocation5 + $0x2b4] ss:$8 sps:$4 sm:$0xff]  }
  0x69   :  { %770 = vmatprep.subr.bf16.mxu0 %v1553_v21  ;;  %v1611_v21 = vld [vmem:[#allocation5 + $0x260] ss:$8 sps:$4 sm:$0xff]   ;;  %v1718_v2 = vld [vmem:[#allocation7 + $0xb4] ss:$8 sps:$4 sm:$0xff]  }
  0x6a   :  { %726 = vmatpush1.bf16.msra.mxu1 %v1626_v42  ;;  %v1641_v42 = vld [vmem:[#allocation5 + $0x2b0] ss:$8 sps:$4 sm:$0xff]  }
  0x6b   :  { %727 = vmatprep.subr.bf16.mxu1 %v1627_v43  ;;  %v1649_v43 = vld [vmem:[#allocation5 + $0x2c4] ss:$8 sps:$4 sm:$0xff]  }
  0x6c   :  { %771 = vmatpush1.bf16.msra.mxu0 %v1555_v24  ;;  %v1329_v24 = vcombine.low %v81_v0, %v81_v0  ;;  %v1673_v0 = vld [vmem:[#allocation5 + $0x300] ss:$8 sps:$4 sm:$0xff]  }
  0x6d   :  { %772 = vmatprep.subr.bf16.mxu0 %v1556_v25  ;;  %v1688_v25 = vld [vmem:[#allocation7 + $0x14] ss:$8 sps:$4 sm:$0xff]  }
  0x6e   :  { %728 = vmatpush1.bf16.msra.mxu1 %v1632_v46  ;;  %v1647_v46 = vld [vmem:[#allocation5 + $0x2c0] ss:$8 sps:$4 sm:$0xff]  }
  0x6f   :  { %729 = vmatprep.subr.bf16.mxu1 %v1633_v47  ;;  %v1655_v47 = vld [vmem:[#allocation5 + $0x2d4] ss:$8 sps:$4 sm:$0xff]  }
  0x70   :  { %773 = vmatpush1.bf16.msra.mxu0 %v1558_v28  ;;  %v1686_v28 = vld [vmem:[#allocation7 + $0x10] ss:$8 sps:$4 sm:$0xff]  }
  0x71   :  { %774 = vmatprep.subr.bf16.mxu0 %v1559_v29  ;;  %v1691_v29 = vld [vmem:[#allocation7 + $0x24] ss:$8 sps:$4 sm:$0xff]  }
  0x72   :  { %730 = vmatpush1.bf16.msra.mxu1 %v1638_v50  ;;  %v1653_v50 = vld [vmem:[#allocation5 + $0x2d0] ss:$8 sps:$4 sm:$0xff]  }
  0x73   :  { %731 = vmatprep.subr.bf16.mxu1 %v1639_v51  ;;  %v1661_v51 = vld [vmem:[#allocation5 + $0x2e4] ss:$8 sps:$4 sm:$0xff]  }
  0x74   :  { %775 = vmatpush1.bf16.msra.mxu0 %v1561_v32  ;;  %v1689_v32 = vld [vmem:[#allocation7 + $0x20] ss:$8 sps:$4 sm:$0xff]  }
  0x75   :  { %776 = vmatprep.subr.bf16.mxu0 %v1562_v33  ;;  %v1694_v33 = vld [vmem:[#allocation7 + $0x34] ss:$8 sps:$4 sm:$0xff]  }
  0x76   :  { %732 = vmatpush1.bf16.msra.mxu1 %v1644_v54  ;;  %v1659_v54 = vld [vmem:[#allocation5 + $0x2e0] ss:$8 sps:$4 sm:$0xff]  }
  0x77   :  { %733 = vmatprep.subr.bf16.mxu1 %v1645_v55  ;;  %v1667_v55 = vld [vmem:[#allocation5 + $0x2f4] ss:$8 sps:$4 sm:$0xff]  }
  0x78   :  { %777 = vmatpush1.bf16.msra.mxu0 %v1564_v36  ;;  %v1692_v36 = vld [vmem:[#allocation7 + $0x30] ss:$8 sps:$4 sm:$0xff]  }
  0x79   :  { %778 = vmatprep.subr.bf16.mxu0 %v1565_v37  ;;  %v1697_v37 = vld [vmem:[#allocation7 + $0x44] ss:$8 sps:$4 sm:$0xff]  }
  0x7a   :  { %734 = vmatpush1.bf16.msra.mxu1 %v1650_v61  ;;  %v1710_v61 = vld [vmem:[#allocation7 + $0x90] ss:$8 sps:$4 sm:$0xff]  }
  0x7b   :  { %735 = vmatprep.subr.bf16.mxu1 %v1651_v62  ;;  %v1715_v62 = vld [vmem:[#allocation7 + $0xa4] ss:$8 sps:$4 sm:$0xff]  }
  0x7c   :  { %779 = vmatpush1.bf16.msra.mxu0 %v1567_v40  ;;  %v1695_v40 = vld [vmem:[#allocation7 + $0x40] ss:$8 sps:$4 sm:$0xff]  }
  0x7d   :  { %780 = vmatprep.subr.bf16.mxu0 %v1568_v41  ;;  %v1700_v41 = vld [vmem:[#allocation7 + $0x54] ss:$8 sps:$4 sm:$0xff]  }
  0x7e   :  { %736 = vmatpush1.bf16.msra.mxu1 %v1656_v3  ;;  %v1877_v3 = vmov 0  }
  0x7f   :  { %737 = vmatprep.subr.bf16.mxu1 %v1657_v4  ;;  %v1716_v4 = vld [vmem:[#allocation7 + $0xb0] ss:$8 sps:$4 sm:$0xff]  }
  0x80   :  { %781 = vmatpush1.bf16.msra.mxu0 %v1570_v44  ;;  %v1698_v44 = vld [vmem:[#allocation7 + $0x50] ss:$8 sps:$4 sm:$0xff]  }
  0x81   :  { %782 = vmatprep.subr.bf16.mxu0 %v1571_v45  ;;  %v1703_v45 = vld [vmem:[#allocation7 + $0x64] ss:$8 sps:$4 sm:$0xff]  }
  0x82   :  { %738 = vmatpush1.bf16.msra.mxu1 %v1662_v7  ;;  %v1682_v7 = vld [vmem:[#allocation2 + $0x18] ss:$0 sps:$4 sm:$0xff]  }
  0x83   :  { %739 = vmatprep.subr.bf16.mxu1 %v1663_v8  ;;  %v1724_v8 = vld [vmem:[#allocation7 + $0xd4] ss:$8 sps:$4 sm:$0xff]  }
  0x84   :  { %783 = vmatpush1.bf16.msra.mxu0 %v1573_v48  ;;  %v1701_v48 = vld [vmem:[#allocation7 + $0x60] ss:$8 sps:$4 sm:$0xff]  }
  0x85   :  { %784 = vmatprep.subr.bf16.mxu0 %v1574_v49  ;;  %v1706_v49 = vld [vmem:[#allocation7 + $0x74] ss:$8 sps:$4 sm:$0xff]  }
  0x86   :  { %740 = vmatpush1.bf16.msra.mxu1 %v1668_v11  ;;  %v1730_v11 = vld [vmem:[#allocation7 + $0xf4] ss:$8 sps:$4 sm:$0xff]  }
  0x87   :  { %741 = vmatprep.subr.bf16.mxu1 %v1671_v12  ;;  %v1728_v12 = vld [vmem:[#allocation7 + $0xf0] ss:$8 sps:$4 sm:$0xff]  }
  0x88   :  { %785 = vmatpush1.bf16.msra.mxu0 %v1576_v52  ;;  %v1704_v52 = vld [vmem:[#allocation7 + $0x70] ss:$8 sps:$4 sm:$0xff]  }
  0x89   :  { %795 = vmatprep.subr.bf16.mxu0 %v1581_v53  ;;  %v1709_v53 = vld [vmem:[#allocation7 + $0x84] ss:$8 sps:$4 sm:$0xff]  }
  0x8a   :  { %742 = vmatpush1.bf16.msra.mxu1 %v1676_v15 }
  0x8b   :  { %787 = vmatmul.mubr.bf16.vlgmr.msra.gmra.mrb[0].mxu0 %v1331_v57  ;;  %743 = vmatprep.subr.bf16.mxu1 %v1677_v16  ;;  %v1707_v57 = vld [vmem:[#allocation7 + $0x80] ss:$8 sps:$4 sm:$0xff]  }
  0x8c   :  { %796 = vmatpush1.bf16.msra.mxu0 %v1579_v58  ;;  %827 = vmatprep.mubr.bf16.mxu0 %v1334_v59  ;;  %v1712_v58 = vld [vmem:[#allocation7 + $0x94] ss:$8 sps:$4 sm:$0xff]   ;;  %v1665_v59 = vld [vmem:[#allocation5 + $0x2f0] ss:$8 sps:$4 sm:$0xff]  }
  0x8d   :  { %797 = vmatprep.subr.bf16.mxu0 %v1584_v60  ;;  %v1675_v60 = vld [vmem:[#allocation5 + $0x304] ss:$8 sps:$4 sm:$0xff]  }
  0x8e   :  { %744 = vmatpush1.bf16.msra.mxu1 %v1679_v19 }
  0x8f   :  { %1085 = vmatprep.subr.bf16.mxu1 %v1685_v20 }
  0x90   :  { %798 = vmatpush1.bf16.msra.mxu0 %v1582_v63  ;;  %v1333_v63 = vcombine.low %v1977_v56, %v1977_v56  ;;  %v1722_v56 = vld [vmem:[#allocation7 + $0xd0] ss:$8 sps:$4 sm:$0xff]  }
  0x91   :  { %799 = vmatprep.subr.bf16.mxu0 %v1589_v1  ;;  %746 = vmatmul.mubr.bf16.vlgmr.msra.gmra.mrb[0].mxu1 %v1329_v24  ;;  %v1713_v1 = vld [vmem:[#allocation7 + $0xa0] ss:$8 sps:$4 sm:$0xff]  }
  0x92   :  { %1086 = vmatpush1.bf16.msra.mxu1 %v1683_v23 }
  0x93   :  { %1087 = vmatprep.subr.bf16.mxu1 %v1688_v25 }
  0x94   :  { %800 = vmatpush1.bf16.msra.mxu0 %v1587_v5  ;;  %v1721_v5 = vld [vmem:[#allocation7 + $0xc4] ss:$8 sps:$4 sm:$0xff]  }
  0x95   :  { %801 = vmatprep.subr.bf16.mxu0 %v1595_v6  ;;  %v1719_v6 = vld [vmem:[#allocation7 + $0xc0] ss:$8 sps:$4 sm:$0xff]  }
  0x96   :  { %1088 = vmatpush1.bf16.msra.mxu1 %v1686_v28 }
  0x97   :  { %1089 = vmatprep.subr.bf16.mxu1 %v1691_v29 }
  0x98   :  { %802 = vmatpush1.bf16.msra.mxu0 %v1593_v9  ;;  %v1727_v9 = vld [vmem:[#allocation7 + $0xe4] ss:$8 sps:$4 sm:$0xff]  }
  0x99   :  { %803 = vmatprep.subr.bf16.mxu0 %v1601_v10  ;;  %v1725_v10 = vld [vmem:[#allocation7 + $0xe0] ss:$8 sps:$4 sm:$0xff]  }
  0x9a   :  { %1090 = vmatpush1.bf16.msra.mxu1 %v1689_v32 }
  0x9b   :  { %1091 = vmatprep.subr.bf16.mxu1 %v1694_v33 }
  0x9c   :  { %804 = vmatpush1.bf16.msra.mxu0 %v1599_v13  ;;  %v1731_v13 = vld [vmem:[#allocation8 + $0x40] sm:$0xff]  }
  0x9d   :  { %805 = vmatprep.subr.bf16.mxu0 %v1607_v14 }
  0x9e   :  { %1092 = vmatpush1.bf16.msra.mxu1 %v1692_v36  ;;  %v1732_v36 = vld [vmem:[#allocation8] sm:$0xff]  }
  0x9f   :  { %1093 = vmatprep.subr.bf16.mxu1 %v1697_v37 }
  0xa0   :  { %806 = vmatpush1.bf16.msra.mxu0 %v1605_v17 }
  0xa1   :  { %807 = vmatprep.subr.bf16.mxu0 %v1613_v18  ;;  %v185_v18 = vlaneseq }
  0xa2   :  { %1094 = vmatpush1.bf16.msra.mxu1 %v1695_v40  ;;  %v1735_v40 = vld [vmem:[#allocation8 + $0x50] sm:$0xff]  }
  0xa3   :  { %1095 = vmatprep.subr.bf16.mxu1 %v1700_v41  ;;  %v186_v19 = vshrl.u32 %v185_v18, 7  ;;  %v1736_v41 = vld [vmem:[#allocation8 + $0x10] sm:$0xff]  }
  0xa4   :  { %808 = vmatpush1.bf16.msra.mxu0 %v1611_v21  ;;  %v183_v21 = vld [vmem:[%s2008_s2] sm:$0x3] }
  0xa5   :  { %809 = vmatprep.subr.bf16.mxu0 %v1619_v22  ;;  %v187_v20 = vsub.s32 0, %v186_v19  ;;  %v191_v22 = vsub.s32 1, %v186_v19 }
  0xa6   :  { %1096 = vmatpush1.bf16.msra.mxu1 %v1698_v44  ;;  %v1739_v44 = vld [vmem:[#allocation8 + $0x60] sm:$0xff]  }
  0xa7   :  { %1097 = vmatprep.subr.bf16.mxu1 %v1703_v45  ;;  %v188_v23 = vrot.slane %v183_v21, %v187_v20  ;;  %v192_v24 = vrot.slane %v183_v21, %v191_v22  ;;  %v1740_v45 = vld [vmem:[#allocation8 + $0x20] sm:$0xff]  }
  0xa8   :  { %810 = vmatpush1.bf16.msra.mxu0 %v1617_v26 }
  0xa9   :  { %811 = vmatprep.subr.bf16.mxu0 %v1625_v27 }
  0xaa   :  { %1098 = vmatpush1.bf16.msra.mxu1 %v1701_v48  ;;  %v1743_v48 = vld [vmem:[#allocation8 + $0x70] sm:$0xff]  }
  0xab   :  { %1099 = vmatprep.subr.bf16.mxu1 %v1706_v49  ;;  %v1744_v49 = vld [vmem:[#allocation8 + $0x30] sm:$0xff]  }
  0xac   :  { %812 = vmatpush1.bf16.msra.mxu0 %v1623_v30 }
  0xad   :  { %813 = vmatprep.subr.bf16.mxu0 %v1631_v31 }
  0xae   :  { %1100 = vmatpush1.bf16.msra.mxu1 %v1704_v52  ;;  %v913_v52 = vld [vmem:[%s2010_s4] sm:$0x3]  ;;  %s1878_s4 = smov [#allocation10]  }
  0xaf   :  { %1101 = vmatprep.subr.bf16.mxu1 %v1709_v53  ;;  %v918_v53 = vrot.slane %v913_v52, %v187_v20  ;;  %s1318_s30 = sshll.u32 %s1878_s4, 4  ;;  %s1319_s30 = int_to_ptr.vmem [resolvable:$true] %s1318_s30 }
  0xb0   :  { %814 = vmatpush1.bf16.msra.mxu0 %v1629_v34  ;;  %s1839_s8 = scalar_lea.vmem %s1319_s30, 128  ;;  %p1844_p5 = scmp.lt.s32.totalorder %s1319_s30, %s1319_s30 }
  0xb1   :  { %815 = vmatprep.subr.bf16.mxu0 %v1637_v35  ;;  %p1840_p4 = scmp.ne.s32.totalorder %s1319_s30, %s1839_s8  ;;  %p1845_p6 = scmp.lt.s32.totalorder %s1839_s8, %s1839_s8 }
  0xb2   :  { %1102 = vmatpush1.bf16.msra.mxu1 %v1707_v57 }
  0xb3   :  { %1103 = vmatprep.subr.bf16.mxu1 %v1712_v58  ;;  %p1846_p7 = por %p1845_p6, %p1844_p5 }
  0xb4   :  { %816 = vmatpush1.bf16.msra.mxu0 %v1635_v38  ;;  %v1733_v38 = vld [vmem:[#allocation8 + $0x48] sm:$0xff]  }
  0xb5   :  { %817 = vmatprep.subr.bf16.mxu0 %v1643_v39  ;;  %v1734_v39 = vld [vmem:[#allocation8 + $0x8] sm:$0xff]   ;;  %p1847_p8 = pnand %p1846_p7, %p1840_p4 }
  0xb6   :  { %1104 = vmatpush1.bf16.msra.mxu1 %v1710_v61 }
  0xb7   :  { %1105 = vmatprep.subr.bf16.mxu1 %v1715_v62 }
  0xb8   :  { %818 = vmatpush1.bf16.msra.mxu0 %v1641_v42  ;;  %v1737_v42 = vld [vmem:[#allocation8 + $0x58] sm:$0xff]  }
  0xb9   :  { %819 = vmatprep.subr.bf16.mxu0 %v1649_v43  ;;  %v1738_v43 = vld [vmem:[#allocation8 + $0x18] sm:$0xff]  }
  0xba   :  { %1106 = vmatpush1.bf16.msra.mxu1 %v1713_v1 }
  0xbb   :  { %1107 = vmatprep.subr.bf16.mxu1 %v1718_v2 }
  0xbc   :  { %820 = vmatpush1.bf16.msra.mxu0 %v1647_v46  ;;  %v1741_v46 = vld [vmem:[#allocation8 + $0x68] sm:$0xff]  }
  0xbd   :  { %821 = vmatprep.subr.bf16.mxu0 %v1655_v47  ;;  %v1742_v47 = vld [vmem:[#allocation8 + $0x28] sm:$0xff]  }
  0xbe   :  { %1108 = vmatpush1.bf16.msra.mxu1 %v1716_v4 }
  0xbf   :  { %1109 = vmatprep.subr.bf16.mxu1 %v1721_v5 }
  0xc0   :  { %822 = vmatpush1.bf16.msra.mxu0 %v1653_v50  ;;  %v1745_v50 = vld [vmem:[#allocation8 + $0x78] sm:$0xff]  }
  0xc1   :  { %823 = vmatprep.subr.bf16.mxu0 %v1661_v51  ;;  %v1746_v51 = vld [vmem:[#allocation8 + $0x38] sm:$0xff]  }
  0xc2   :  { %1110 = vmatpush1.bf16.msra.mxu1 %v1719_v6 }
  0xc3   :  { %1111 = vmatprep.subr.bf16.mxu1 %v1724_v8 }
  0xc4   :  { %824 = vmatpush1.bf16.msra.mxu0 %v1659_v54  ;;  %v922_v54 = vrot.slane %v913_v52, %v191_v22 }
  0xc5   :  { %825 = vmatprep.subr.bf16.mxu0 %v1667_v55 }
  0xc6   :  { %1112 = vmatpush1.bf16.msra.mxu1 %v1722_v56 }
  0xc7   :  { %1113 = vmatprep.subr.bf16.mxu1 %v1727_v9 }
  0xc8   :  { %826 = vmatpush1.bf16.msra.mxu0 %v1665_v59 }
  0xc9   :  { %836 = vmatprep.subr.bf16.mxu0 %v1675_v60 }
  0xca   :  { %1114 = vmatpush1.bf16.msra.mxu1 %v1725_v10 }
  0xcb   :  { %828 = vmatmul.mubr.bf16.vlgmr.msra.gmra.mrb[0].mxu0 %v1333_v63  ;;  %1115 = vmatprep.subr.bf16.mxu1 %v1730_v11 }
  0xcc   :  { %837 = vmatpush1.bf16.msra.mxu0 %v1673_v0  ;;  %868 = vmatprep.mubr.bf16.mxu0 %v1877_v3  ;;  %v1467_v3 = vld [vmem:[%s2012_s6] ss:$0 sm:$0xff] }
  0xce   :  { %1116 = vmatpush1.bf16.msra.mxu1 %v1728_v12 }
  0xcf   :  { %1485 = vmatprep.subr.bf16.mxu1 %v1731_v13 }
  0xd7   :  { %1434 = vmatmul.mubr.msk.bf16.vlgmr.msra.gmra.mrb[0].mxu0 %vm709_vm0, %v1682_v7 }
 0x164   :  { %v747_v14 = vpop.f32.mrb[0].mxu1 }
 0x165   :  { %v749_v15 = vpop.f32.mrb[1].mxu1  ;;  %v748_v25 = vadd.f32 %v747_v14, %v188_v23 }
 0x166   :  { %v751_v16 = vpop.f32.mrb[2].mxu1  ;;  %v750_v26 = vadd.f32 %v749_v15, %v192_v24 }
 0x167   :  { %v752_v17 = vpop.f32.mrb[3].mxu1 }
 0x1aa   :  { %v870_v27 = vpop.f32.mrb[0].mxu0 }
 0x1ab   :  { %v1508_v28 = vadd.f32 %v870_v27, %v748_v25  ;;  %v872_v29 = vpop.f32.mrb[1].mxu0 }
 0x1ac   :  { %v1510_v30 = vadd.f32 %v872_v29, %v750_v26  ;;  %v874_v31 = vpop.f32.mrb[2].mxu0 }
 0x1ad   :  { %v877_v32 = vmax.f32 %v1508_v28, 0.0  ;;  %v875_v33 = vpop.f32.mrb[3].mxu0 }
 0x1ae   :  { %v878_v34 = vmax.f32 %v1510_v30, 0.0 }
 0x1af   :  { %v879_v37 = vpack.c.bf16 %v877_v32, %v877_v32 }
 0x1b0   :  { %v880_v35 = vpack.c.bf16 %v878_v34, %v878_v34 }
 0x1b2   :  { %1117 = vmatprep.mubr.bf16.mxu1 %v880_v35 }
 0x1b3   :  { %1118 = vmatmul.mubr.bf16.vlgmr.msra.gmra.mrb[4].mxu1 %v879_v37 }
 0x1b4   :  { %1486 = vmatpush3.bf16.msra.mxu1 %v1732_v36 }
 0x1b5   :  { %1487 = vmatprep.subr.bf16.mxu1 %v1733_v38 }
 0x1b8   :  { %1488 = vmatpush3.bf16.msra.mxu1 %v1734_v39 }
 0x1b9   :  { %1489 = vmatprep.subr.bf16.mxu1 %v1735_v40 }
 0x1bc   :  { %1490 = vmatpush3.bf16.msra.mxu1 %v1736_v41 }
 0x1bd   :  { %1491 = vmatprep.subr.bf16.mxu1 %v1737_v42 }
 0x1c0   :  { %1492 = vmatpush3.bf16.msra.mxu1 %v1738_v43 }
 0x1c1   :  { %1493 = vmatprep.subr.bf16.mxu1 %v1739_v44 }
 0x1c4   :  { %1494 = vmatpush3.bf16.msra.mxu1 %v1740_v45 }
 0x1c5   :  { %1495 = vmatprep.subr.bf16.mxu1 %v1741_v46 }
 0x1c8   :  { %1496 = vmatpush3.bf16.msra.mxu1 %v1742_v47 }
 0x1c9   :  { %1497 = vmatprep.subr.bf16.mxu1 %v1743_v48 }
 0x1cc   :  { %1498 = vmatpush3.bf16.msra.mxu1 %v1744_v49 }
 0x1cd   :  { %1499 = vmatprep.subr.bf16.mxu1 %v1745_v50 }
 0x1d0   :  { %1500 = vmatpush3.bf16.msra.mxu1 %v1746_v51 }
 0x286   :  { %v1119_v55 = vpop.f32.mrb[4].mxu1 }
 0x287   :  { %v1120_v57 = vadd.f32 %v1119_v55, %v918_v53  ;;  %v1121_v58 = vpop.f32.mrb[5].mxu1 }
 0x288   :  { %v1122_v59 = vadd.f32 %v1121_v58, %v922_v54  ;;  %v1123_v60 = vpop.f32.mrb[6].mxu1 }
 0x289   :  { %v1126_v61 = vmax.f32 %v1120_v57, 0.0  ;;  %v1124_v62 = vpop.f32.mrb[7].mxu1 }
 0x28a   :  { %v1127_v63 = vmax.f32 %v1122_v59, 0.0 }
 0x28b   :  { %v1128_v1 = vpack.c.bf16 %v1126_v61, %v1126_v61 }
 0x28c   :  { %v1129_v0 = vpack.c.bf16 %v1127_v63, %v1127_v63 }
 0x28e   :  { %1297 = vmatprep.mubr.bf16.mxu1 %v1129_v0 }
 0x28f   :  { %1298 = vmatmul.mubr.bf16.vlgmr.msra.gmra.mrb[8].mxu1 %v1128_v1 }
 0x362   :  { %v1501_v2 = vpop.f32.mrb[8].mxu1 }
 0x363   :  { %v1502_v4 = vpop.f32.mrb[9].mxu1 }
 0x364   :  { %v1503_v5 = vadd.f32 %v1502_v4, %v1501_v2  ;;  %v1504_v6 = vpop.f32.mrb[10].mxu1 }
 0x365   :  { %v1505_v7 = vpop.f32.mrb[11].mxu1 }
 0x366   :  { %v1300_v56 = vadd.f32 %v1503_v5, %v1467_v3 }
 0x368   :  { %v1484_v8 = vmul.f32 -1.442695, %v1300_v56 }
 0x36a   :  { %1747 = vpow2.f32 %v1484_v8 }
 0x374   :  { %v1748_v9 = vpop.eup %1747 }
 0x375   :  { %v1308_v10 = vadd.f32 1.0, %v1748_v9 }
 0x377   :  { %1749 = vrcp.f32 %v1308_v10 }
 0x381   :  { %v1750_v11 = vpop.eup %1749 }
 0x382   :  { %1311 = vst [vmem:[#allocation10] sm:$0xff] %v1750_v11 }
 0x383   :  { %1850 = shalt.err (!%p1847_p8)
}
 0x384   :  { %s1851_s10 = scalar_lea.hbm %s2013_s7, 128 }
 0x385   :  { %p1852_p9 = scmp.ne.s32.totalorder %s2013_s7, %s1851_s10  ;;  %p1855_p10 = scmp.lt.u32.totalorder %s1851_s10, %s2013_s7 }
 0x387   :  { %p1857_p11 = pnand %p1855_p10, %p1852_p9 }
 0x389   :  { %1860 = shalt.err (!%p1857_p11)
}
 0x38a   :  { %1321 = dma.vmem_to_hbm [thread:$0]  %s1319_s30, 128, %s2013_s7, [#allocation4]  }
 0x38b   :  { %1867 = dma.done.wait [#allocation4], 128  }
 0x38c   :  { %1868 = vsyncadd [#allocation4], 4294967168 }
 0x38d   :  { %1325 = vsyncpa [#allocation3], 1 }
 0x38e   :  { %1326 = vsyncpa [#allocation6], 1 }
 0x38f   :  { %1327 = vsyncpa [#allocation9], 1 }
 0x390   :  { %1328 = vsyncpa [#allocation4], 1 }

</bundles_post_ra>
